<compile_context>
chip_gen: v7x
topology: tpu7x:2x2x1
jax: 0.10.0
libtpu: 0.0.40
codegen_flags: <defaults>
</compile_context>

<pallas_src>
import functools

import jax
import jax.numpy as jnp
from jax import lax
from jax.experimental import pallas as pl
from jax.experimental.pallas import tpu as pltpu

VMEM_LIMIT = 32 * 1024 * 1024


# ----------------------------------------------------------------------------
# helpers
# ----------------------------------------------------------------------------
def _round_up(x, m):
    return ((x + m - 1) // m) * m


def _pad_to(a, shape):
    pads = [(0, s - d) for d, s in zip(a.shape, shape)]
    return jnp.pad(a, pads)


def _choose_batch_block(B):
    """Batch block: fill MXU rows (<=256) but keep >=2 'parallel' blocks when
    the batch allows (v7x has 2 TensorCores sharded along parallel axes)."""
    bp0 = _round_up(max(B, 8), 8)
    if bp0 <= 8:
        return 8, 8
    half = _round_up((bp0 + 1) // 2, 8)
    bt = min(256, half)
    bp = _round_up(bp0, bt)
    return bt, bp


def _choose_time_chunk(T, Hp, Bt):
    """Time chunk: as large as possible (<=32) while the f32 proj scratch
    (Tc, Bt, Hp) stays under ~4 MiB."""
    budget = (4 * 1024 * 1024) // max(1, Bt * Hp * 4)
    return max(1, min(T, 32, budget))


# ----------------------------------------------------------------------------
# Shared recurrence chunk: fused input projection + serial tanh recurrence.
# ----------------------------------------------------------------------------
def _run_chunk(x_ref, wih_ref, b_ref, whh_ref, h_ref, proj_ref, out_seq_ref,
               *, chunk, seq_len, unroll):
    t_idx = pl.program_id(1)

    @pl.when(t_idx == 0)
    def _():
        h_ref[...] = jnp.zeros_like(h_ref)

    tc, bt, din = x_ref.shape
    hp = whh_ref.shape[0]

    # Fused input projection for the whole chunk: one wide MXU matmul
    # (bf16 operands, f32 accumulate), bias b_ih + b_hh pre-folded.
    x_flat = x_ref[...].reshape(tc * bt, din)
    proj_ref[...] = (
        jnp.dot(x_flat, wih_ref[...], preferred_element_type=jnp.float32)
        + b_ref[...]).reshape(tc, bt, hp)

    whh = whh_ref[...]                      # hoist: stays f32 for numerics
    needs_mask = (seq_len % chunk) != 0
    t_base = t_idx * chunk

    def step(i, h):
        pre = proj_ref[i] + jnp.dot(h, whh,
                                    preferred_element_type=jnp.float32)
        h_new = jnp.tanh(pre)
        if needs_mask:
            # Padded timesteps (beyond the real sequence) carry h unchanged.
            h_new = jnp.where(t_base + i < seq_len, h_new, h)
        if out_seq_ref is not None:
            out_seq_ref[i] = h_new.astype(out_seq_ref.dtype)
        return h_new

    h_final = lax.fori_loop(0, chunk, step, h_ref[...], unroll=unroll)
    h_ref[...] = h_final
    return h_final


def _rnn_seq_layer_kernel(x_ref, wih_ref, b_ref, whh_ref, out_ref,
                          h_ref, proj_ref, *, chunk, seq_len, unroll):
    _run_chunk(x_ref, wih_ref, b_ref, whh_ref, h_ref, proj_ref, out_ref,
               chunk=chunk, seq_len=seq_len, unroll=unroll)


def _rnn_last_head_kernel(x_ref, wih_ref, b_ref, whh_ref,
                          wfc_ref, bfc_ref, wh_ref, bh_ref, out_ref,
                          h_ref, proj_ref, *, chunk, seq_len, unroll, ko, k):
    h_final = _run_chunk(x_ref, wih_ref, b_ref, whh_ref, h_ref, proj_ref,
                         None, chunk=chunk, seq_len=seq_len, unroll=unroll)

    # Head only on the final time chunk; the (Bt, Np) output block is
    # resident across the time axis and flushed once.
    @pl.when(pl.program_id(1) == pl.num_programs(1) - 1)
    def _():
        # fc + BatchNorm(eval, folded) + ReLU.  Dropout is identity at eval.
        hfc = jnp.dot(h_final, wfc_ref[...],
                      preferred_element_type=jnp.float32) + bfc_ref[...]
        hfc = jnp.maximum(hfc, 0.0)

        # Single fused lane-dense matmul for [mu | sigma | alpha | pad].
        z = jnp.dot(hfc, wh_ref[...],
                    preferred_element_type=jnp.float32) + bh_ref[...]
        col = lax.broadcasted_iota(jnp.int32, z.shape, 1)

        sig_mask = jnp.logical_and(col >= ko, col < 2 * ko)
        sigma_v = jnp.maximum(jnp.exp(jnp.where(sig_mask, z, 0.0)), 1e-6)

        a_mask = jnp.logical_and(col >= 2 * ko, col < 2 * ko + k)
        a_logits = jnp.where(a_mask, z, -1e30)
        a_max = jnp.max(a_logits, axis=1, keepdims=True)
        a_exp = jnp.where(a_mask, jnp.exp(a_logits - a_max), 0.0)
        a_sum = jnp.sum(a_exp, axis=1, keepdims=True)
        alpha_v = a_exp * pl.reciprocal(a_sum, approx=True)

        out_ref[...] = jnp.where(col < ko, z,
                                 jnp.where(col < 2 * ko, sigma_v, alpha_v))


# ----------------------------------------------------------------------------
# pallas_call wrappers
# ----------------------------------------------------------------------------
def rnn_seq_layer(seq, w_ih_t, b_fold, w_hh_t, *, seq_len, chunk, batch_block):
    Tp, Bp, Din = seq.shape
    Hp = w_hh_t.shape[0]
    unroll = min(chunk, 8)
    kernel = functools.partial(_rnn_seq_layer_kernel, chunk=chunk,
                               seq_len=seq_len, unroll=unroll)
    return pl.pallas_call(
        kernel,
        out_shape=jax.ShapeDtypeStruct((Tp, Bp, Hp), jnp.bfloat16),
        grid=(Bp // batch_block, Tp // chunk),
        in_specs=[
            pl.BlockSpec((chunk, batch_block, Din), lambda b, t: (t, b, 0)),
            pl.BlockSpec((Din, Hp), lambda b, t: (0, 0)),
            pl.BlockSpec((1, Hp), lambda b, t: (0, 0)),
            pl.BlockSpec((Hp, Hp), lambda b, t: (0, 0)),
        ],
        out_specs=pl.BlockSpec((chunk, batch_block, Hp),
                               lambda b, t: (t, b, 0)),
        scratch_shapes=[pltpu.VMEM((batch_block, Hp), jnp.float32),
                        pltpu.VMEM((chunk, batch_block, Hp), jnp.float32)],
        compiler_params=pltpu.CompilerParams(
            dimension_semantics=("parallel", "arbitrary"),
            vmem_limit_bytes=VMEM_LIMIT),
    )(seq, w_ih_t, b_fold, w_hh_t)


def rnn_last_layer_head(seq, w_ih_t, b_fold, w_hh_t, wfc, bfc, wh, bh, *,
                        seq_len, chunk, batch_block, ko, k):
    Tp, Bp, Din = seq.shape
    Hp = w_hh_t.shape[0]
    Np = wh.shape[1]
    unroll = min(chunk, 8)
    kernel = functools.partial(_rnn_last_head_kernel, chunk=chunk,
                               seq_len=seq_len, unroll=unroll, ko=ko, k=k)
    return pl.pallas_call(
        kernel,
        out_shape=jax.ShapeDtypeStruct((Bp, Np), jnp.float32),
        grid=(Bp // batch_block, Tp // chunk),
        in_specs=[
            pl.BlockSpec((chunk, batch_block, Din), lambda b, t: (t, b, 0)),
            pl.BlockSpec((Din, Hp), lambda b, t: (0, 0)),
            pl.BlockSpec((1, Hp), lambda b, t: (0, 0)),
            pl.BlockSpec((Hp, Hp), lambda b, t: (0, 0)),
            pl.BlockSpec((Hp, Hp), lambda b, t: (0, 0)),
            pl.BlockSpec((1, Hp), lambda b, t: (0, 0)),
            pl.BlockSpec((Hp, Np), lambda b, t: (0, 0)),
            pl.BlockSpec((1, Np), lambda b, t: (0, 0)),
        ],
        out_specs=pl.BlockSpec((batch_block, Np), lambda b, t: (b, 0)),
        scratch_shapes=[pltpu.VMEM((batch_block, Hp), jnp.float32),
                        pltpu.VMEM((chunk, batch_block, Hp), jnp.float32)],
        compiler_params=pltpu.CompilerParams(
            dimension_semantics=("parallel", "arbitrary"),
            vmem_limit_bytes=VMEM_LIMIT),
    )(seq, w_ih_t, b_fold, w_hh_t, wfc, bfc, wh, bh)


# ----------------------------------------------------------------------------
# Full forward (eval-mode semantics of the PyTorch RNN_MDN module).
# ----------------------------------------------------------------------------
def rnn_mdn_forward(x_btd, params, *, hidden_dim):
    B, T, D = x_btd.shape
    H = hidden_dim
    Hp = _round_up(H, 128)
    Bt, Bp = _choose_batch_block(B)
    Tc = _choose_time_chunk(T, Hp, Bt)
    Tp = _round_up(T, Tc)

    KO = params["mu_w"].shape[0]
    K = params["alpha_w"].shape[0]
    Np = _round_up(2 * KO + K, 128)

    # One small transpose of the raw input to time-major; all intermediate
    # activations are produced time-major (bf16) directly by the kernels.
    x = jnp.transpose(x_btd, (1, 0, 2)).astype(jnp.bfloat16)
    x = _pad_to(x, (Tp, Bp, D))

    # Fold BatchNorm1d (eval: running stats) into the fc weights.
    eps = 1e-5
    scale = params["bn_gamma"] * lax.rsqrt(params["bn_var"] + eps)
    wfc = params["fc_w"].T * scale[None, :]
    bfc = (params["fc_b"] - params["bn_mean"]) * scale + params["bn_beta"]
    wfc_p = _pad_to(wfc.astype(jnp.float32), (Hp, Hp))
    bfc_p = _pad_to(bfc.reshape(1, -1).astype(jnp.float32), (1, Hp))

    # Concatenate the three MDN heads into one lane-dense matmul.
    w_head = jnp.concatenate([params["mu_w"].T, params["sigma_w"].T,
                              params["alpha_w"].T], axis=1)
    b_head = jnp.concatenate([params["mu_b"], params["sigma_b"],
                              params["alpha_b"]])
    wh_p = _pad_to(w_head.astype(jnp.float32), (Hp, Np))
    bh_p = _pad_to(b_head.reshape(1, -1).astype(jnp.float32), (1, Np))

    seq = x
    n_layers = len(params["rnn_layers"])
    out_slab = None
    for li, (w_ih, w_hh, b_ih, b_hh) in enumerate(params["rnn_layers"]):
        Din = seq.shape[-1]
        w_ih_t = _pad_to(w_ih.T.astype(jnp.float32),
                         (Din, Hp)).astype(jnp.bfloat16)
        b_fold = _pad_to((b_ih + b_hh).reshape(1, -1).astype(jnp.float32),
                         (1, Hp))
        w_hh_t = _pad_to(w_hh.T.astype(jnp.float32), (Hp, Hp))

        if li < n_layers - 1:
            # TODO(synk): nn.RNN inter-layer dropout is identity at inference.
            seq = rnn_seq_layer(seq, w_ih_t, b_fold, w_hh_t,
                                seq_len=T, chunk=Tc, batch_block=Bt)
        else:
            out_slab = rnn_last_layer_head(
                seq, w_ih_t, b_fold, w_hh_t, wfc_p, bfc_p, wh_p, bh_p,
                seq_len=T, chunk=Tc, batch_block=Bt, ko=KO, k=K)

    mu = out_slab[:B, 0:KO]
    sigma = out_slab[:B, KO:2 * KO]
    alpha = out_slab[:B, 2 * KO:2 * KO + K]
    return mu, sigma, alpha


# ----------------------------------------------------------------------------
# Deterministic parameter construction (PyTorch-style uniform init).
# ----------------------------------------------------------------------------
def init_params(key, input_dim, hidden_dim, num_layers, num_mixtures,
                output_dim):
    params = {}
    ks = 1.0 / jnp.sqrt(hidden_dim)

    def unif(k, shape):
        return jax.random.uniform(k, shape, jnp.float32, -ks, ks)

    layers = []
    for layer in range(num_layers):
        d_in = input_dim if layer == 0 else hidden_dim
        key, k1, k2, k3, k4 = jax.random.split(key, 5)
        layers.append((unif(k1, (hidden_dim, d_in)),        # weight_ih_l{k}
                       unif(k2, (hidden_dim, hidden_dim)),  # weight_hh_l{k}
                       unif(k3, (hidden_dim,)),             # bias_ih_l{k}
                       unif(k4, (hidden_dim,))))            # bias_hh_l{k}
    params["rnn_layers"] = layers

    key, k1, k2 = jax.random.split(key, 3)
    params["fc_w"] = unif(k1, (hidden_dim, hidden_dim))
    params["fc_b"] = unif(k2, (hidden_dim,))

    params["bn_gamma"] = jnp.ones((hidden_dim,), jnp.float32)
    params["bn_beta"] = jnp.zeros((hidden_dim,), jnp.float32)
    params["bn_mean"] = jnp.zeros((hidden_dim,), jnp.float32)
    params["bn_var"] = jnp.ones((hidden_dim,), jnp.float32)

    KO = num_mixtures * output_dim
    key, k1, k2, k3, k4, k5, k6 = jax.random.split(key, 7)
    params["mu_w"] = unif(k1, (KO, hidden_dim))
    params["mu_b"] = unif(k2, (KO,))
    params["sigma_w"] = unif(k3, (KO, hidden_dim))
    params["sigma_b"] = unif(k4, (KO,))
    params["alpha_w"] = unif(k5, (num_mixtures, hidden_dim))
    params["alpha_b"] = unif(k6, (num_mixtures,))
    return params


# ----------------------------------------------------------------------------
# Pure-JAX reference (eval-mode) for a sanity check.
# ----------------------------------------------------------------------------
def _reference_forward(x, params, hidden_dim):
    B, T, _ = x.shape
    out = x.astype(jnp.float32)
    for (w_ih, w_hh, b_ih, b_hh) in params["rnn_layers"]:
        h = jnp.zeros((B, hidden_dim), jnp.float32)
        ys = []
        for t in range(T):
            h = jnp.tanh(out[:, t, :] @ w_ih.T + b_ih + h @ w_hh.T + b_hh)
            ys.append(h)
        out = jnp.stack(ys, axis=1)
    last = out[:, -1, :]
    scale = params["bn_gamma"] / jnp.sqrt(params["bn_var"] + 1e-5)
    hfc = last @ params["fc_w"].T + params["fc_b"]
    hbn = (hfc - params["bn_mean"]) * scale + params["bn_beta"]
    hr = jnp.maximum(hbn, 0.0)
    mu = hr @ params["mu_w"].T + params["mu_b"]
    sigma = jnp.maximum(
        jnp.exp(hr @ params["sigma_w"].T + params["sigma_b"]), 1e-6)
    alpha = jax.nn.softmax(hr @ params["alpha_w"].T + params["alpha_b"],
                           axis=1)
    return mu, sigma, alpha


if __name__ == "__main__":
    B, T = 2, 8
    input_dim, hidden_dim, num_layers = 16, 32, 2
    num_mixtures, output_dim = 5, 3

    key = jax.random.PRNGKey(0)
    key, xkey = jax.random.split(key)
    x = jax.random.normal(xkey, (B, T, input_dim), jnp.float32)
    params = init_params(key, input_dim, hidden_dim, num_layers,
                         num_mixtures, output_dim)

    mu, sigma, alpha = rnn_mdn_forward(x, params, hidden_dim=hidden_dim)
    jax.block_until_ready((mu, sigma, alpha))

    KO = num_mixtures * output_dim
    assert mu.shape == (B, KO)
    assert sigma.shape == (B, KO)
    assert alpha.shape == (B, num_mixtures)

    mu_r, sigma_r, alpha_r = _reference_forward(x, params, hidden_dim)
    assert jnp.allclose(mu, mu_r, atol=2e-2, rtol=2e-2)
    assert jnp.allclose(sigma, sigma_r, atol=2e-2, rtol=2e-2)
    assert jnp.allclose(alpha, alpha_r, atol=2e-2, rtol=2e-2)

    print("KERNEL_OK")
</pallas_src>

<mosaic_0001>
module attributes {stable_mosaic.version = 11 : i64} {
  func.func @_rnn_seq_layer_kernel(%arg0: i32, %arg1: i32, %arg2: memref<8x8x16xbf16, #tpu.memory_space<vmem>>, %arg3: memref<16x128xbf16, #tpu.memory_space<vmem>>, %arg4: memref<1x128xf32, #tpu.memory_space<vmem>>, %arg5: memref<128x128xf32, #tpu.memory_space<vmem>>, %arg6: memref<8x8x128xbf16, #tpu.memory_space<vmem>>, %arg7: memref<8x128xf32, #tpu.memory_space<vmem>>, %arg8: memref<8x8x128xf32, #tpu.memory_space<vmem>>) attributes {dimension_semantics = [#tpu.dimension_semantics<parallel>, #tpu.dimension_semantics<arbitrary>], iteration_bounds = array<i64: 1, 1>, scalar_prefetch = 0 : i64, scratch_operands = 2 : i64, tpu.core_type = #tpu.core_type<tc>, window_params = [{transform_indices = @transform_0, window_bounds = array<i64: 8, 8, 16>}, {pipeline_mode = #tpu.pipeline_mode<synchronous>, transform_indices = @transform_1, window_bounds = array<i64: 16, 128>}, {pipeline_mode = #tpu.pipeline_mode<synchronous>, transform_indices = @transform_2, window_bounds = array<i64: 1, 128>}, {pipeline_mode = #tpu.pipeline_mode<synchronous>, transform_indices = @transform_3, window_bounds = array<i64: 128, 128>}, {transform_indices = @transform_4, window_bounds = array<i64: 8, 8, 128>}]} {
    %c0_i32 = arith.constant 0 : i32
    %0 = arith.cmpi eq, %arg1, %c0_i32 : i32
    %1 = arith.extui %0 : i1 to i32
    %c0_i32_0 = arith.constant 0 : i32
    %2 = arith.cmpi ne, %1, %c0_i32_0 : i32
    scf.if %2 {
      %cst_57 = arith.constant 0.000000e+00 : f32
      %103 = vector.broadcast %cst_57 : f32 to vector<8x128xf32>
      %c0_58 = arith.constant 0 : index
      %c0_59 = arith.constant 0 : index
      %104 = vector.load %arg7[%c0_58, %c0_59] : memref<8x128xf32, #tpu.memory_space<vmem>>, vector<8x128xf32>
      tpu.vector_store %arg7[%c0_58, %c0_59], %103 {strides = array<i32>} : memref<8x128xf32, #tpu.memory_space<vmem>>, vector<8x128xf32>,
    } else {
    }
    %c0 = arith.constant 0 : index
    %c0_1 = arith.constant 0 : index
    %c0_2 = arith.constant 0 : index
    %3 = vector.load %arg2[%c0, %c0_1, %c0_2] : memref<8x8x16xbf16, #tpu.memory_space<vmem>>, vector<8x8x16xbf16>
    %4 = vector.shape_cast %3 : vector<8x8x16xbf16> to vector<64x16xbf16>
    %c0_3 = arith.constant 0 : index
    %c0_4 = arith.constant 0 : index
    %5 = vector.load %arg3[%c0_3, %c0_4] : memref<16x128xbf16, #tpu.memory_space<vmem>>, vector<16x128xbf16>
    %cst = arith.constant dense<0.000000e+00> : vector<64x128xf32>
    %6 = tpu.matmul %4, %5, %cst {dimension_numbers = #tpu.dot_dimension_numbers<[1], [0], [0], [1], [0, 0, 1, 1], [], []>} : vector<64x16xbf16>, vector<16x128xbf16>, vector<64x128xf32> -> vector<64x128xf32>
    %c0_5 = arith.constant 0 : index
    %c0_6 = arith.constant 0 : index
    %7 = vector.load %arg4[%c0_5, %c0_6] : memref<1x128xf32, #tpu.memory_space<vmem>>, vector<1x128xf32>
    %8 = vector.broadcast %7 : vector<1x128xf32> to vector<64x128xf32>
    %9 = arith.addf %6, %8 : vector<64x128xf32>
    %10 = vector.shape_cast %9 : vector<64x128xf32> to vector<8x8x128xf32>
    %c0_7 = arith.constant 0 : index
    %c0_8 = arith.constant 0 : index
    %c0_9 = arith.constant 0 : index
    %11 = vector.load %arg8[%c0_7, %c0_8, %c0_9] : memref<8x8x128xf32, #tpu.memory_space<vmem>>, vector<8x8x128xf32>
    tpu.vector_store %arg8[%c0_7, %c0_8, %c0_9], %10 {strides = array<i32>} : memref<8x8x128xf32, #tpu.memory_space<vmem>>, vector<8x8x128xf32>,
    %c0_10 = arith.constant 0 : index
    %c0_11 = arith.constant 0 : index
    %12 = vector.load %arg5[%c0_10, %c0_11] : memref<128x128xf32, #tpu.memory_space<vmem>>, vector<128x128xf32>
    %c0_12 = arith.constant 0 : index
    %c0_13 = arith.constant 0 : index
    %13 = vector.load %arg7[%c0_12, %c0_13] : memref<8x128xf32, #tpu.memory_space<vmem>>, vector<8x128xf32>
    %c0_i32_14 = arith.constant 0 : i32
    %14 = arith.index_cast %c0_i32_14 : i32 to index
    %c0_15 = arith.constant 0 : index
    %c0_16 = arith.constant 0 : index
    %15 = vector.load %arg8[%14, %c0_15, %c0_16] : memref<8x8x128xf32, #tpu.memory_space<vmem>>, vector<1x8x128xf32>
    %16 = vector.shape_cast %15 : vector<1x8x128xf32> to vector<8x128xf32>
    %cst_17 = arith.constant dense<0.000000e+00> : vector<8x128xf32>
    %17 = tpu.matmul %13, %12, %cst_17 {dimension_numbers = #tpu.dot_dimension_numbers<[1], [0], [0], [1], [0, 0, 1, 1], [], []>} : vector<8x128xf32>, vector<128x128xf32>, vector<8x128xf32> -> vector<8x128xf32>
    %18 = arith.addf %16, %17 : vector<8x128xf32>
    %19 = math.tanh %18 : vector<8x128xf32>
    %20 = arith.truncf %19 : vector<8x128xf32> to vector<8x128xbf16>
    %21 = arith.index_cast %c0_i32_14 : i32 to index
    %c0_18 = arith.constant 0 : index
    %c0_19 = arith.constant 0 : index
    %22 = vector.load %arg6[%21, %c0_18, %c0_19] : memref<8x8x128xbf16, #tpu.memory_space<vmem>>, vector<1x8x128xbf16>
    %23 = vector.shape_cast %22 : vector<1x8x128xbf16> to vector<8x128xbf16>
    %24 = vector.shape_cast %20 : vector<8x128xbf16> to vector<1x8x128xbf16>
    tpu.vector_store %arg6[%21, %c0_18, %c0_19], %24 {strides = array<i32>} : memref<8x8x128xbf16, #tpu.memory_space<vmem>>, vector<1x8x128xbf16>,
    %c1_i32 = arith.constant 1 : i32
    %25 = arith.index_cast %c1_i32 : i32 to index
    %c0_20 = arith.constant 0 : index
    %c0_21 = arith.constant 0 : index
    %26 = vector.load %arg8[%25, %c0_20, %c0_21] : memref<8x8x128xf32, #tpu.memory_space<vmem>>, vector<1x8x128xf32>
    %27 = vector.shape_cast %26 : vector<1x8x128xf32> to vector<8x128xf32>
    %cst_22 = arith.constant dense<0.000000e+00> : vector<8x128xf32>
    %28 = tpu.matmul %19, %12, %cst_22 {dimension_numbers = #tpu.dot_dimension_numbers<[1], [0], [0], [1], [0, 0, 1, 1], [], []>} : vector<8x128xf32>, vector<128x128xf32>, vector<8x128xf32> -> vector<8x128xf32>
    %29 = arith.addf %27, %28 : vector<8x128xf32>
    %30 = math.tanh %29 : vector<8x128xf32>
    %31 = arith.truncf %30 : vector<8x128xf32> to vector<8x128xbf16>
    %32 = arith.index_cast %c1_i32 : i32 to index
    %c0_23 = arith.constant 0 : index
    %c0_24 = arith.constant 0 : index
    %33 = vector.load %arg6[%32, %c0_23, %c0_24] : memref<8x8x128xbf16, #tpu.memory_space<vmem>>, vector<1x8x128xbf16>
    %34 = vector.shape_cast %33 : vector<1x8x128xbf16> to vector<8x128xbf16>
    %35 = vector.shape_cast %31 : vector<8x128xbf16> to vector<1x8x128xbf16>
    tpu.vector_store %arg6[%32, %c0_23, %c0_24], %35 {strides = array<i32>} : memref<8x8x128xbf16, #tpu.memory_space<vmem>>, vector<1x8x128xbf16>,
    %c2_i32 = arith.constant 2 : i32
    %36 = arith.index_cast %c2_i32 : i32 to index
    %c0_25 = arith.constant 0 : index
    %c0_26 = arith.constant 0 : index
    %37 = vector.load %arg8[%36, %c0_25, %c0_26] : memref<8x8x128xf32, #tpu.memory_space<vmem>>, vector<1x8x128xf32>
    %38 = vector.shape_cast %37 : vector<1x8x128xf32> to vector<8x128xf32>
    %cst_27 = arith.constant dense<0.000000e+00> : vector<8x128xf32>
    %39 = tpu.matmul %30, %12, %cst_27 {dimension_numbers = #tpu.dot_dimension_numbers<[1], [0], [0], [1], [0, 0, 1, 1], [], []>} : vector<8x128xf32>, vector<128x128xf32>, vector<8x128xf32> -> vector<8x128xf32>
    %40 = arith.addf %38, %39 : vector<8x128xf32>
    %41 = math.tanh %40 : vector<8x128xf32>
    %42 = arith.truncf %41 : vector<8x128xf32> to vector<8x128xbf16>
    %43 = arith.index_cast %c2_i32 : i32 to index
    %c0_28 = arith.constant 0 : index
    %c0_29 = arith.constant 0 : index
    %44 = vector.load %arg6[%43, %c0_28, %c0_29] : memref<8x8x128xbf16, #tpu.memory_space<vmem>>, vector<1x8x128xbf16>
    %45 = vector.shape_cast %44 : vector<1x8x128xbf16> to vector<8x128xbf16>
    %46 = vector.shape_cast %42 : vector<8x128xbf16> to vector<1x8x128xbf16>
    tpu.vector_store %arg6[%43, %c0_28, %c0_29], %46 {strides = array<i32>} : memref<8x8x128xbf16, #tpu.memory_space<vmem>>, vector<1x8x128xbf16>,
    %c3_i32 = arith.constant 3 : i32
    %47 = arith.index_cast %c3_i32 : i32 to index
    %c0_30 = arith.constant 0 : index
    %c0_31 = arith.constant 0 : index
    %48 = vector.load %arg8[%47, %c0_30, %c0_31] : memref<8x8x128xf32, #tpu.memory_space<vmem>>, vector<1x8x128xf32>
    %49 = vector.shape_cast %48 : vector<1x8x128xf32> to vector<8x128xf32>
    %cst_32 = arith.constant dense<0.000000e+00> : vector<8x128xf32>
    %50 = tpu.matmul %41, %12, %cst_32 {dimension_numbers = #tpu.dot_dimension_numbers<[1], [0], [0], [1], [0, 0, 1, 1], [], []>} : vector<8x128xf32>, vector<128x128xf32>, vector<8x128xf32> -> vector<8x128xf32>
    %51 = arith.addf %49, %50 : vector<8x128xf32>
    %52 = math.tanh %51 : vector<8x128xf32>
    %53 = arith.truncf %52 : vector<8x128xf32> to vector<8x128xbf16>
    %54 = arith.index_cast %c3_i32 : i32 to index
    %c0_33 = arith.constant 0 : index
    %c0_34 = arith.constant 0 : index
    %55 = vector.load %arg6[%54, %c0_33, %c0_34] : memref<8x8x128xbf16, #tpu.memory_space<vmem>>, vector<1x8x128xbf16>
    %56 = vector.shape_cast %55 : vector<1x8x128xbf16> to vector<8x128xbf16>
    %57 = vector.shape_cast %53 : vector<8x128xbf16> to vector<1x8x128xbf16>
    tpu.vector_store %arg6[%54, %c0_33, %c0_34], %57 {strides = array<i32>} : memref<8x8x128xbf16, #tpu.memory_space<vmem>>, vector<1x8x128xbf16>,
    %c4_i32 = arith.constant 4 : i32
    %58 = arith.index_cast %c4_i32 : i32 to index
    %c0_35 = arith.constant 0 : index
    %c0_36 = arith.constant 0 : index
    %59 = vector.load %arg8[%58, %c0_35, %c0_36] : memref<8x8x128xf32, #tpu.memory_space<vmem>>, vector<1x8x128xf32>
    %60 = vector.shape_cast %59 : vector<1x8x128xf32> to vector<8x128xf32>
    %cst_37 = arith.constant dense<0.000000e+00> : vector<8x128xf32>
    %61 = tpu.matmul %52, %12, %cst_37 {dimension_numbers = #tpu.dot_dimension_numbers<[1], [0], [0], [1], [0, 0, 1, 1], [], []>} : vector<8x128xf32>, vector<128x128xf32>, vector<8x128xf32> -> vector<8x128xf32>
    %62 = arith.addf %60, %61 : vector<8x128xf32>
    %63 = math.tanh %62 : vector<8x128xf32>
    %64 = arith.truncf %63 : vector<8x128xf32> to vector<8x128xbf16>
    %65 = arith.index_cast %c4_i32 : i32 to index
    %c0_38 = arith.constant 0 : index
    %c0_39 = arith.constant 0 : index
    %66 = vector.load %arg6[%65, %c0_38, %c0_39] : memref<8x8x128xbf16, #tpu.memory_space<vmem>>, vector<1x8x128xbf16>
    %67 = vector.shape_cast %66 : vector<1x8x128xbf16> to vector<8x128xbf16>
    %68 = vector.shape_cast %64 : vector<8x128xbf16> to vector<1x8x128xbf16>
    tpu.vector_store %arg6[%65, %c0_38, %c0_39], %68 {strides = array<i32>} : memref<8x8x128xbf16, #tpu.memory_space<vmem>>, vector<1x8x128xbf16>,
    %c5_i32 = arith.constant 5 : i32
    %69 = arith.index_cast %c5_i32 : i32 to index
    %c0_40 = arith.constant 0 : index
    %c0_41 = arith.constant 0 : index
    %70 = vector.load %arg8[%69, %c0_40, %c0_41] : memref<8x8x128xf32, #tpu.memory_space<vmem>>, vector<1x8x128xf32>
    %71 = vector.shape_cast %70 : vector<1x8x128xf32> to vector<8x128xf32>
    %cst_42 = arith.constant dense<0.000000e+00> : vector<8x128xf32>
    %72 = tpu.matmul %63, %12, %cst_42 {dimension_numbers = #tpu.dot_dimension_numbers<[1], [0], [0], [1], [0, 0, 1, 1], [], []>} : vector<8x128xf32>, vector<128x128xf32>, vector<8x128xf32> -> vector<8x128xf32>
    %73 = arith.addf %71, %72 : vector<8x128xf32>
    %74 = math.tanh %73 : vector<8x128xf32>
    %75 = arith.truncf %74 : vector<8x128xf32> to vector<8x128xbf16>
    %76 = arith.index_cast %c5_i32 : i32 to index
    %c0_43 = arith.constant 0 : index
    %c0_44 = arith.constant 0 : index
    %77 = vector.load %arg6[%76, %c0_43, %c0_44] : memref<8x8x128xbf16, #tpu.memory_space<vmem>>, vector<1x8x128xbf16>
    %78 = vector.shape_cast %77 : vector<1x8x128xbf16> to vector<8x128xbf16>
    %79 = vector.shape_cast %75 : vector<8x128xbf16> to vector<1x8x128xbf16>
    tpu.vector_store %arg6[%76, %c0_43, %c0_44], %79 {strides = array<i32>} : memref<8x8x128xbf16, #tpu.memory_space<vmem>>, vector<1x8x128xbf16>,
    %c6_i32 = arith.constant 6 : i32
    %80 = arith.index_cast %c6_i32 : i32 to index
    %c0_45 = arith.constant 0 : index
    %c0_46 = arith.constant 0 : index
    %81 = vector.load %arg8[%80, %c0_45, %c0_46] : memref<8x8x128xf32, #tpu.memory_space<vmem>>, vector<1x8x128xf32>
    %82 = vector.shape_cast %81 : vector<1x8x128xf32> to vector<8x128xf32>
    %cst_47 = arith.constant dense<0.000000e+00> : vector<8x128xf32>
    %83 = tpu.matmul %74, %12, %cst_47 {dimension_numbers = #tpu.dot_dimension_numbers<[1], [0], [0], [1], [0, 0, 1, 1], [], []>} : vector<8x128xf32>, vector<128x128xf32>, vector<8x128xf32> -> vector<8x128xf32>
    %84 = arith.addf %82, %83 : vector<8x128xf32>
    %85 = math.tanh %84 : vector<8x128xf32>
    %86 = arith.truncf %85 : vector<8x128xf32> to vector<8x128xbf16>
    %87 = arith.index_cast %c6_i32 : i32 to index
    %c0_48 = arith.constant 0 : index
    %c0_49 = arith.constant 0 : index
    %88 = vector.load %arg6[%87, %c0_48, %c0_49] : memref<8x8x128xbf16, #tpu.memory_space<vmem>>, vector<1x8x128xbf16>
    %89 = vector.shape_cast %88 : vector<1x8x128xbf16> to vector<8x128xbf16>
    %90 = vector.shape_cast %86 : vector<8x128xbf16> to vector<1x8x128xbf16>
    tpu.vector_store %arg6[%87, %c0_48, %c0_49], %90 {strides = array<i32>} : memref<8x8x128xbf16, #tpu.memory_space<vmem>>, vector<1x8x128xbf16>,
    %c7_i32 = arith.constant 7 : i32
    %91 = arith.index_cast %c7_i32 : i32 to index
    %c0_50 = arith.constant 0 : index
    %c0_51 = arith.constant 0 : index
    %92 = vector.load %arg8[%91, %c0_50, %c0_51] : memref<8x8x128xf32, #tpu.memory_space<vmem>>, vector<1x8x128xf32>
    %93 = vector.shape_cast %92 : vector<1x8x128xf32> to vector<8x128xf32>
    %cst_52 = arith.constant dense<0.000000e+00> : vector<8x128xf32>
    %94 = tpu.matmul %85, %12, %cst_52 {dimension_numbers = #tpu.dot_dimension_numbers<[1], [0], [0], [1], [0, 0, 1, 1], [], []>} : vector<8x128xf32>, vector<128x128xf32>, vector<8x128xf32> -> vector<8x128xf32>
    %95 = arith.addf %93, %94 : vector<8x128xf32>
    %96 = math.tanh %95 : vector<8x128xf32>
    %97 = arith.truncf %96 : vector<8x128xf32> to vector<8x128xbf16>
    %98 = arith.index_cast %c7_i32 : i32 to index
    %c0_53 = arith.constant 0 : index
    %c0_54 = arith.constant 0 : index
    %99 = vector.load %arg6[%98, %c0_53, %c0_54] : memref<8x8x128xbf16, #tpu.memory_space<vmem>>, vector<1x8x128xbf16>
    %100 = vector.shape_cast %99 : vector<1x8x128xbf16> to vector<8x128xbf16>
    %101 = vector.shape_cast %97 : vector<8x128xbf16> to vector<1x8x128xbf16>
    tpu.vector_store %arg6[%98, %c0_53, %c0_54], %101 {strides = array<i32>} : memref<8x8x128xbf16, #tpu.memory_space<vmem>>, vector<1x8x128xbf16>,
    %c8_i32 = arith.constant 8 : i32
    %c0_55 = arith.constant 0 : index
    %c0_56 = arith.constant 0 : index
    %102 = vector.load %arg7[%c0_55, %c0_56] : memref<8x128xf32, #tpu.memory_space<vmem>>, vector<8x128xf32>
    tpu.vector_store %arg7[%c0_55, %c0_56], %96 {strides = array<i32>} : memref<8x128xf32, #tpu.memory_space<vmem>>, vector<8x128xf32>,
    return
  }
  func.func @transform_0(%arg0: i32, %arg1: i32) -> (i32, i32, i32) {
    %c0_i32 = arith.constant 0 : i32
    %c0_i32_0 = arith.constant 0 : i32
    return %arg1, %arg0, %c0_i32 : i32, i32, i32
  }
  func.func @transform_1(%arg0: i32, %arg1: i32) -> (i32, i32) {
    %c0_i32 = arith.constant 0 : i32
    %c0_i32_0 = arith.constant 0 : i32
    %c0_i32_1 = arith.constant 0 : i32
    return %c0_i32, %c0_i32_0 : i32, i32
  }
  func.func @transform_2(%arg0: i32, %arg1: i32) -> (i32, i32) {
    %c0_i32 = arith.constant 0 : i32
    %c0_i32_0 = arith.constant 0 : i32
    %c0_i32_1 = arith.constant 0 : i32
    return %c0_i32, %c0_i32_0 : i32, i32
  }
  func.func @transform_3(%arg0: i32, %arg1: i32) -> (i32, i32) {
    %c0_i32 = arith.constant 0 : i32
    %c0_i32_0 = arith.constant 0 : i32
    %c0_i32_1 = arith.constant 0 : i32
    return %c0_i32, %c0_i32_0 : i32, i32
  }
  func.func @transform_4(%arg0: i32, %arg1: i32) -> (i32, i32, i32) {
    %c0_i32 = arith.constant 0 : i32
    %c0_i32_0 = arith.constant 0 : i32
    return %arg1, %arg0, %c0_i32 : i32, i32, i32
  }
}

</mosaic_0001>

<bundles_post_ra>
// kernel: tpu_custom_call.1
= control target key start
LH: loop header
LB: loop body
LE: loop exit
PB: predicated region body
PF: predicated region fallthrough
CT: control target
= control target key end

     0   :  { %9 = vsyncpa [#allocation5], 0  ;;  %s1896_s0 = inlined_call_operand.hbm [shape: bf16[8,8,16], index: 0, kind: input, shape index: {}]   ;;  %s1897_s1 = inlined_call_operand.hbm [shape: bf16[16,128], index: 1, kind: input, shape index: {}]   ;;  %s1898_s2 = inlined_call_operand.vmem [shape: f32[1,128], index: 2, kind: input, shape index: {}]   ;;  %s1899_s3 = inlined_call_operand.hbm [shape: f32[128,128], index: 3, kind: input, shape index: {}]   ;;  %s1900_s4 = inlined_call_operand.hbm [shape: bf16[8,8,128], index: 4, kind: output, shape index: {}]  }
   0x1   :  { %10 = vsyncpa [#allocation8], 0 }
   0x2   :  { %11 = vsyncpa [#allocation6], 0  ;;  %s1603_s15 = smov [#allocation7]   ;;  %s1604_s17 = smov [#allocation4]  }
   0x3   :  { %s29_s16 = sshll.u32 %s1603_s15, 4  ;;  %s17_s18 = sshll.u32 %s1604_s17, 4  ;;  %s30_s16 = int_to_ptr.vmem [resolvable:$true] %s29_s16  ;;  %s1639_s18 = int_to_ptr.vmem [resolvable:$true] %s17_s18 }
   0x4   :  { %s1509_s21 = scalar_lea.hbm %s1897_s1, 128 }
   0x5   :  { %p1510_p0 = scmp.ne.s32.totalorder %s1897_s1, %s1509_s21  ;;  %p1513_p1 = scmp.lt.u32.totalorder %s1509_s21, %s1897_s1 }
   0x7   :  { %p1515_p2 = pnand %p1513_p1, %p1510_p0 }
   0x9   :  { %1518 = shalt.err (!%p1515_p2)
}
   0xa   :  { %s1519_s26 = scalar_lea.vmem %s30_s16, 128  ;;  %p1524_p4 = scmp.lt.s32.totalorder %s30_s16, %s30_s16 }
   0xb   :  { %p1520_p3 = scmp.ne.s32.totalorder %s30_s16, %s1519_s26  ;;  %p1525_p5 = scmp.lt.s32.totalorder %s1519_s26, %s1519_s26 }
   0xd   :  { %p1526_p6 = por %p1525_p5, %p1524_p4 }
   0xf   :  { %p1527_p7 = pnand %p1526_p6, %p1520_p3 }
  0x11   :  { %1530 = shalt.err (!%p1527_p7)
}
  0x12   :  { %s1605_s27 = smov 64   ;;  %s1606_s28 = smov 4  }
  0x13   :  { %35 = dma.hbm_to_vmem [thread:$0]  %s1897_s1, 128, %s30_s16, [#allocation8], %s1605_s27, %s1605_s27, %s1606_s28  }
  0x14   :  { %s1531_s7 = scalar_lea.hbm %s1896_s0, 512 }
  0x15   :  { %p1532_p8 = scmp.ne.s32.totalorder %s1896_s0, %s1531_s7  ;;  %p1535_p9 = scmp.lt.u32.totalorder %s1531_s7, %s1896_s0 }
  0x17   :  { %p1537_p10 = pnand %p1535_p9, %p1532_p8 }
  0x19   :  { %1540 = shalt.err (!%p1537_p10)
}
  0x1a   :  { %s1541_s12 = scalar_lea.vmem %s1639_s18, 512  ;;  %p1546_p12 = scmp.lt.s32.totalorder %s1639_s18, %s1639_s18 }
  0x1b   :  { %p1542_p11 = scmp.ne.s32.totalorder %s1639_s18, %s1541_s12  ;;  %p1547_p13 = scmp.lt.s32.totalorder %s1541_s12, %s1541_s12 }
  0x1d   :  { %p1548_p0 = por %p1547_p13, %p1546_p12 }
  0x1f   :  { %p1549_p1 = pnand %p1548_p0, %p1542_p11 }
  0x21   :  { %1552 = shalt.err (!%p1549_p1)
}
  0x22   :  { %23 = dma.hbm_to_vmem [thread:$0]  %s1896_s0, 512, %s1639_s18, [#allocation5], %s1605_s27, %s1605_s27, %s1606_s28  }
  0x23   :  { %s1607_s14 = smov [#allocation9]   ;;  %s1553_s19 = scalar_lea.hbm %s1899_s3, 2048 }
  0x24   :  { %s43_s15 = sshll.u32 %s1607_s14, 4  ;;  %p1554_p2 = scmp.ne.s32.totalorder %s1899_s3, %s1553_s19  ;;  %s44_s15 = int_to_ptr.vmem [resolvable:$true] %s43_s15 }
  0x25   :  { %p1557_p3 = scmp.lt.u32.totalorder %s1553_s19, %s1899_s3 }
  0x27   :  { %p1559_p4 = pnand %p1557_p3, %p1554_p2 }
  0x29   :  { %1562 = shalt.err (!%p1559_p4)
}
  0x2a   :  { %s1563_s24 = scalar_lea.vmem %s44_s15, 2048  ;;  %p1568_p6 = scmp.lt.s32.totalorder %s44_s15, %s44_s15 }
  0x2b   :  { %p1564_p5 = scmp.ne.s32.totalorder %s44_s15, %s1563_s24  ;;  %p1569_p7 = scmp.lt.s32.totalorder %s1563_s24, %s1563_s24 }
  0x2d   :  { %p1570_p8 = por %p1569_p7, %p1568_p6 }
  0x2f   :  { %p1571_p9 = pnand %p1570_p8, %p1564_p5 }
  0x31   :  { %1574 = shalt.err (!%p1571_p9)
}
  0x32   :  { %s1608_s0 = smov 128   ;;  %s1609_s18 = smov 8  }
  0x33   :  { %49 = dma.hbm_to_vmem [thread:$0]  %s1899_s3, 2048, %s44_s15, [#allocation8], %s1608_s0, %s1608_s0, %s1609_s18  }
  0x34   :  { %1597 = dma.done.wait [#allocation5], 512  }
  0x35   :  { %1598 = vsyncadd [#allocation5], 4294966784 }
  0x36   :  { %1599 = dma.done.wait [#allocation8], 2176  }
  0x37   :  { %1600 = vsyncadd [#allocation8], 4294965120  ;;  %v1610_v0 = vmov 0.0|0.0   ;;  %vm1611_vm0 = vmmov 0   ;;  %v1612_v1 = vmov 0.0   ;;  %v194_v2 = vld [vmem:[#allocation9] sm:$0xff] }
  0x38   :  { %1285 = vmatprep.subr.bf16.mxu1 %v1610_v0  ;;  %1037 = vmatprep.mubr.msk.f32.mxu1 %vm1611_vm0, %v1612_v1  ;;  %v195_v3 = vld [vmem:[#allocation9 + $0x8] sm:$0xff]  ;;  %v196_v4 = vld [vmem:[#allocation9 + $0x10] sm:$0xff]  ;;  %v197_v6 = vld [vmem:[#allocation9 + $0x18] sm:$0xff]  ;;  %vm108_vm1 = vcmask 130048  }
  0x39   :  { %v1691_v5 = vpack.c.bf16 %v195_v3, %v194_v2  ;;  %v1694_v7 = vpack.c.bf16 %v197_v6, %v196_v4  ;;  %v198_v8 = vld [vmem:[#allocation9 + $0x20] sm:$0xff]  ;;  %v199_v9 = vld [vmem:[#allocation9 + $0x28] sm:$0xff]  ;;  %v1488_v10 = vld [vmem:[#allocation7] sm:$0xff]  }
  0x3a   :  { %v1489_v11 = vld [vmem:[#allocation4] sm:$0xff]   ;;  %995 = vmatprep.subr.bf16.mxu0 %v1488_v10  ;;  %v1698_v12 = vpack.c.bf16 %v199_v9, %v198_v8  ;;  %v200_v13 = vld [vmem:[#allocation9 + $0x30] sm:$0xff]  ;;  %v1490_v14 = vld [vmem:[#allocation4 + $0x8] sm:$0xff]  }
  0x3b   :  { %1287 = vmatpush3.bf16.msra.mxu1 %v1691_v5  ;;  %996 = vmatpush3.bf16.msra.mxu0 %v1488_v10  ;;  %v201_v15 = vld [vmem:[#allocation9 + $0x38] sm:$0xff]  ;;  %v202_v17 = vld [vmem:[#allocation9 + $0x40] sm:$0xff]  ;;  %v203_v18 = vld [vmem:[#allocation9 + $0x48] sm:$0xff] }
  0x3c   :  { %1288 = vmatprep.subr.bf16.mxu1 %v1610_v0  ;;  %997 = vmatprep.mubr.msk.bf16.mxu0 %vm108_vm1, %v1489_v11  ;;  %v1705_v16 = vpack.c.bf16 %v201_v15, %v200_v13  ;;  %v1711_v19 = vpack.c.bf16 %v203_v18, %v202_v17  ;;  %v204_v20 = vld [vmem:[#allocation9 + $0x50] sm:$0xff]  ;;  %v205_v21 = vld [vmem:[#allocation9 + $0x58] sm:$0xff]  ;;  %v206_v23 = vld [vmem:[#allocation9 + $0x60] sm:$0xff] }
  0x3d   :  { %1309 = vmatprep.subr.bf16.mxu0 %v1610_v0  ;;  %v1717_v22 = vpack.c.bf16 %v205_v21, %v204_v20  ;;  %v207_v24 = vld [vmem:[#allocation9 + $0x68] sm:$0xff]  ;;  %v208_v26 = vld [vmem:[#allocation9 + $0x70] sm:$0xff]  ;;  %v209_v27 = vld [vmem:[#allocation9 + $0x78] sm:$0xff] }
  0x3e   :  { %998 = vmatmul.mubr.msk.bf16.vlgmr.msra.gmra.mrb[0].mxu0 %vm108_vm1, %v1490_v14  ;;  %v1723_v25 = vpack.c.bf16 %v207_v24, %v206_v23  ;;  %v1729_v28 = vpack.c.bf16 %v209_v27, %v208_v26  ;;  %v1491_v29 = vld [vmem:[#allocation4 + $0x10] sm:$0xff]   ;;  %v1492_v30 = vld [vmem:[#allocation4 + $0x18] sm:$0xff]   ;;  %v1770_v35 = vld [vmem:[%s1898_s2] ss:$0 sm:$0xff]  ;;  %s1613_s2 = smov [#allocation10]  }
  0x3f   :  { %1290 = vmatpush3.bf16.msra.mxu1 %v1694_v7  ;;  %1311 = vmatpush3.bf16.msra.mxu0 %v1691_v5  ;;  %s831_s30 = sshll.u32 %s1613_s2, 4  ;;  %s832_s30 = int_to_ptr.vmem [resolvable:$true] %s831_s30 }
  0x40   :  { %1291 = vmatprep.subr.bf16.mxu1 %v1610_v0  ;;  %1312 = vmatprep.subr.bf16.mxu0 %v1610_v0  ;;  %s1575_s5 = scalar_lea.vmem %s832_s30, 512  ;;  %p1580_p11 = scmp.lt.s32.totalorder %s832_s30, %s832_s30 }
  0x41   :  { %1001 = vmatprep.mubr.msk.bf16.mxu0 %vm108_vm1, %v1491_v29  ;;  %p1576_p10 = scmp.ne.s32.totalorder %s832_s30, %s1575_s5  ;;  %p1581_p12 = scmp.lt.s32.totalorder %s1575_s5, %s1575_s5 }
  0x43   :  { %1293 = vmatpush3.bf16.msra.mxu1 %v1698_v12  ;;  %1314 = vmatpush3.bf16.msra.mxu0 %v1694_v7  ;;  %p1582_p13 = por %p1581_p12, %p1580_p11 }
  0x44   :  { %1294 = vmatprep.subr.bf16.mxu1 %v1610_v0  ;;  %1315 = vmatprep.subr.bf16.mxu0 %v1610_v0 }
  0x45   :  { %p1583_p0 = pnand %p1582_p13, %p1576_p10 }
  0x46   :  { %1002 = vmatmul.mubr.msk.bf16.gmra.mrb[4].mxu0 %vm108_vm1, %v1492_v30 }
  0x47   :  { %1296 = vmatpush3.bf16.msra.mxu1 %v1705_v16  ;;  %1317 = vmatpush3.bf16.msra.mxu0 %v1698_v12 }
  0x48   :  { %1297 = vmatprep.subr.bf16.mxu1 %v1610_v0  ;;  %1318 = vmatprep.subr.bf16.mxu0 %v1610_v0 }
  0x49   :  { %1072 = vmatprep.mubr.msk.f32.mxu0 %vm1611_vm0, %v1612_v1 }
  0x4b   :  { %1299 = vmatpush3.bf16.msra.mxu1 %v1711_v19  ;;  %1320 = vmatpush3.bf16.msra.mxu0 %v1705_v16 }
  0x4c   :  { %1300 = vmatprep.subr.bf16.mxu1 %v1610_v0  ;;  %1321 = vmatprep.subr.bf16.mxu0 %v1610_v0 }
  0x4f   :  { %1302 = vmatpush3.bf16.msra.mxu1 %v1717_v22  ;;  %1323 = vmatpush3.bf16.msra.mxu0 %v1711_v19 }
  0x50   :  { %1303 = vmatprep.subr.bf16.mxu1 %v1610_v0  ;;  %1324 = vmatprep.subr.bf16.mxu0 %v1610_v0 }
  0x53   :  { %1305 = vmatpush3.bf16.msra.mxu1 %v1723_v25  ;;  %1326 = vmatpush3.bf16.msra.mxu0 %v1717_v22 }
  0x54   :  { %1306 = vmatprep.subr.bf16.mxu1 %v1610_v0  ;;  %1327 = vmatprep.subr.bf16.mxu0 %v1610_v0 }
  0x57   :  { %1308 = vmatpush3.bf16.msra.mxu1 %v1729_v28  ;;  %1329 = vmatpush3.bf16.msra.mxu0 %v1723_v25 }
  0x58   :  { %1333 = vmatprep.subr.bf16.mxu1 %v1610_v0  ;;  %1330 = vmatprep.subr.bf16.mxu0 %v1610_v0 }
  0x5a   :  { %1038 = vmatmul.mubr.f32.vlgmr.msra.gmra.mrb[0].mxu1 %v1612_v1 }
  0x5b   :  { %1335 = vmatpush3.bf16.msra.mxu1 %v1691_v5  ;;  %1107 = vmatprep.mubr.msk.f32.mxu1 %vm1611_vm0, %v1612_v1 }
  0x5c   :  { %1336 = vmatprep.subr.bf16.mxu1 %v1610_v0  ;;  %1332 = vmatpush3.bf16.msra.mxu0 %v1729_v28 }
  0x5d   :  { %1357 = vmatprep.subr.bf16.mxu0 %v1610_v0 }
  0x5f   :  { %1338 = vmatpush3.bf16.msra.mxu1 %v1694_v7 }
  0x60   :  { %1339 = vmatprep.subr.bf16.mxu1 %v1610_v0 }
  0x63   :  { %1341 = vmatpush3.bf16.msra.mxu1 %v1698_v12 }
  0x64   :  { %1342 = vmatprep.subr.bf16.mxu1 %v1610_v0 }
  0x67   :  { %1344 = vmatpush3.bf16.msra.mxu1 %v1705_v16 }
  0x68   :  { %1345 = vmatprep.subr.bf16.mxu1 %v1610_v0 }
  0x6b   :  { %1347 = vmatpush3.bf16.msra.mxu1 %v1711_v19 }
  0x6c   :  { %1348 = vmatprep.subr.bf16.mxu1 %v1610_v0 }
  0x6f   :  { %1350 = vmatpush3.bf16.msra.mxu1 %v1717_v22 }
  0x70   :  { %1351 = vmatprep.subr.bf16.mxu1 %v1610_v0 }
  0x73   :  { %1353 = vmatpush3.bf16.msra.mxu1 %v1723_v25 }
  0x74   :  { %1354 = vmatprep.subr.bf16.mxu1 %v1610_v0 }
  0x77   :  { %1356 = vmatpush3.bf16.msra.mxu1 %v1729_v28 }
  0x78   :  { %1381 = vmatprep.subr.bf16.mxu1 %v1610_v0 }
 0x111   :  { %v999_v31 = vpop.f32.mrb[0].mxu0 }
 0x112   :  { %v155_v32 = vpop.f32.mrb[1].mxu0  ;;  %v164_v52 = vadd.f32 %v999_v31, %v1770_v35 }
 0x113   :  { %v1765_v33 = vpop.f32.mrb[2].mxu0  ;;  %v156_v36 = vadd.f32 %v1770_v35, %v155_v32 }
 0x114   :  { %v158_v34 = vpop.f32.mrb[3].mxu0  ;;  %v167_v58 = vadd.f32 %v1765_v33, %v1770_v35 }
 0x115   :  { %v159_v46 = vadd.f32 %v1770_v35, %v158_v34 }
 0x119   :  { %v1791_v42 = vpop.f32.mrb[4].mxu0 }
 0x11a   :  { %v1793_v43 = vpop.f32.mrb[5].mxu0  ;;  %v180_v13 = vadd.f32 %v1791_v42, %v1770_v35 }
 0x11b   :  { %v1795_v44 = vpop.f32.mrb[6].mxu0  ;;  %v172_v2 = vadd.f32 %v1770_v35, %v1793_v43 }
 0x11c   :  { %v1797_v45 = vpop.f32.mrb[7].mxu0  ;;  %v183_v18 = vadd.f32 %v1795_v44, %v1770_v35 }
 0x12d   :  { %v278_v37 = vpop.f32.mrb[0].mxu1 }
 0x12e   :  { %v282_v38 = vadd.f32 %v278_v37, %v156_v36  ;;  %v1039_v39 = vpop.f32.mrb[1].mxu1 }
 0x130   :  { %1493 = vtanh.f32 %v282_v38 }
 0x13a   :  { %v1494_v40 = vpop.eup %1493 }
 0x13b   :  { %v284_v41 = vpack.c.bf16 %v1494_v40, %v1494_v40  ;;  %1073 = vmatmul.mubr.f32.vlgmr.msra.gmra.mrb[8].mxu0 %v1494_v40 }
 0x13c   :  { %1359 = vmatpush3.bf16.msra.mxu0 %v1691_v5  ;;  %1142 = vmatprep.mubr.msk.f32.mxu0 %vm1611_vm0, %v1612_v1 }
 0x13d   :  { %285 = vst [vmem:[#allocation10] sm:$0xf] %v284_v41  ;;  %1360 = vmatprep.subr.bf16.mxu0 %v1610_v0 }
 0x140   :  { %1362 = vmatpush3.bf16.msra.mxu0 %v1694_v7 }
 0x141   :  { %1363 = vmatprep.subr.bf16.mxu0 %v1610_v0 }
 0x144   :  { %1365 = vmatpush3.bf16.msra.mxu0 %v1698_v12 }
 0x145   :  { %1366 = vmatprep.subr.bf16.mxu0 %v1610_v0 }
 0x148   :  { %1368 = vmatpush3.bf16.msra.mxu0 %v1705_v16 }
 0x149   :  { %1369 = vmatprep.subr.bf16.mxu0 %v1610_v0 }
 0x14c   :  { %1371 = vmatpush3.bf16.msra.mxu0 %v1711_v19 }
 0x14d   :  { %1372 = vmatprep.subr.bf16.mxu0 %v1610_v0 }
 0x150   :  { %1374 = vmatpush3.bf16.msra.mxu0 %v1717_v22 }
 0x151   :  { %1375 = vmatprep.subr.bf16.mxu0 %v1610_v0 }
 0x154   :  { %1377 = vmatpush3.bf16.msra.mxu0 %v1723_v25 }
 0x155   :  { %1378 = vmatprep.subr.bf16.mxu0 %v1610_v0 }
 0x158   :  { %1380 = vmatpush3.bf16.msra.mxu0 %v1729_v28 }
 0x159   :  { %1405 = vmatprep.subr.bf16.mxu0 %v1610_v0 }
 0x20e   :  { %v354_v47 = vpop.f32.mrb[8].mxu0 }
 0x20f   :  { %v358_v48 = vadd.f32 %v354_v47, %v159_v46  ;;  %v1074_v49 = vpop.f32.mrb[9].mxu0 }
 0x211   :  { %1495 = vtanh.f32 %v358_v48 }
 0x21b   :  { %v1496_v50 = vpop.eup %1495 }
 0x21c   :  { %v360_v51 = vpack.c.bf16 %v1496_v50, %v1496_v50  ;;  %1108 = vmatmul.mubr.f32.vlgmr.msra.gmra.mrb[2].mxu1 %v1496_v50 }
 0x21d   :  { %1383 = vmatpush3.bf16.msra.mxu1 %v1691_v5  ;;  %1177 = vmatprep.mubr.msk.f32.mxu1 %vm1611_vm0, %v1612_v1 }
 0x21e   :  { %362 = vst [vmem:[#allocation10 + $0x4] sm:$0xf] %v360_v51  ;;  %1384 = vmatprep.subr.bf16.mxu1 %v1610_v0 }
 0x221   :  { %1386 = vmatpush3.bf16.msra.mxu1 %v1694_v7 }
 0x222   :  { %1387 = vmatprep.subr.bf16.mxu1 %v1610_v0 }
 0x225   :  { %1389 = vmatpush3.bf16.msra.mxu1 %v1698_v12 }
 0x226   :  { %1390 = vmatprep.subr.bf16.mxu1 %v1610_v0 }
 0x229   :  { %1392 = vmatpush3.bf16.msra.mxu1 %v1705_v16 }
 0x22a   :  { %1393 = vmatprep.subr.bf16.mxu1 %v1610_v0 }
 0x22d   :  { %1395 = vmatpush3.bf16.msra.mxu1 %v1711_v19 }
 0x22e   :  { %1396 = vmatprep.subr.bf16.mxu1 %v1610_v0 }
 0x231   :  { %1398 = vmatpush3.bf16.msra.mxu1 %v1717_v22 }
 0x232   :  { %1399 = vmatprep.subr.bf16.mxu1 %v1610_v0 }
 0x235   :  { %1401 = vmatpush3.bf16.msra.mxu1 %v1723_v25 }
 0x236   :  { %1402 = vmatprep.subr.bf16.mxu1 %v1610_v0 }
 0x239   :  { %1404 = vmatpush3.bf16.msra.mxu1 %v1729_v28 }
 0x23a   :  { %1429 = vmatprep.subr.bf16.mxu1 %v1610_v0 }
 0x2ef   :  { %v431_v53 = vpop.f32.mrb[2].mxu1 }
 0x2f0   :  { %v435_v54 = vadd.f32 %v431_v53, %v164_v52  ;;  %v1109_v55 = vpop.f32.mrb[3].mxu1 }
 0x2f2   :  { %1497 = vtanh.f32 %v435_v54 }
 0x2fc   :  { %v1498_v56 = vpop.eup %1497 }
 0x2fd   :  { %v437_v57 = vpack.c.bf16 %v1498_v56, %v1498_v56  ;;  %1143 = vmatmul.mubr.f32.vlgmr.msra.gmra.mrb[10].mxu0 %v1498_v56 }
 0x2fe   :  { %1407 = vmatpush3.bf16.msra.mxu0 %v1691_v5  ;;  %1212 = vmatprep.mubr.msk.f32.mxu0 %vm1611_vm0, %v1612_v1 }
 0x2ff   :  { %439 = vst [vmem:[#allocation10 + $0x8] sm:$0xf] %v437_v57  ;;  %1408 = vmatprep.subr.bf16.mxu0 %v1610_v0 }
 0x302   :  { %1410 = vmatpush3.bf16.msra.mxu0 %v1694_v7 }
 0x303   :  { %1411 = vmatprep.subr.bf16.mxu0 %v1610_v0 }
 0x306   :  { %1413 = vmatpush3.bf16.msra.mxu0 %v1698_v12 }
 0x307   :  { %1414 = vmatprep.subr.bf16.mxu0 %v1610_v0 }
 0x30a   :  { %1416 = vmatpush3.bf16.msra.mxu0 %v1705_v16 }
 0x30b   :  { %1417 = vmatprep.subr.bf16.mxu0 %v1610_v0 }
 0x30e   :  { %1419 = vmatpush3.bf16.msra.mxu0 %v1711_v19 }
 0x30f   :  { %1420 = vmatprep.subr.bf16.mxu0 %v1610_v0 }
 0x312   :  { %1422 = vmatpush3.bf16.msra.mxu0 %v1717_v22 }
 0x313   :  { %1423 = vmatprep.subr.bf16.mxu0 %v1610_v0 }
 0x316   :  { %1425 = vmatpush3.bf16.msra.mxu0 %v1723_v25 }
 0x317   :  { %1426 = vmatprep.subr.bf16.mxu0 %v1610_v0 }
 0x31a   :  { %1428 = vmatpush3.bf16.msra.mxu0 %v1729_v28 }
 0x31b   :  { %1453 = vmatprep.subr.bf16.mxu0 %v1610_v0 }
 0x3d0   :  { %v508_v59 = vpop.f32.mrb[10].mxu0 }
 0x3d1   :  { %v512_v60 = vadd.f32 %v508_v59, %v167_v58  ;;  %v1144_v61 = vpop.f32.mrb[11].mxu0 }
 0x3d3   :  { %1499 = vtanh.f32 %v512_v60 }
 0x3dd   :  { %v1500_v62 = vpop.eup %1499 }
 0x3de   :  { %v514_v63 = vpack.c.bf16 %v1500_v62, %v1500_v62  ;;  %1178 = vmatmul.mubr.f32.vlgmr.msra.gmra.mrb[4].mxu1 %v1500_v62 }
 0x3df   :  { %1431 = vmatpush3.bf16.msra.mxu1 %v1691_v5  ;;  %1247 = vmatprep.mubr.msk.f32.mxu1 %vm1611_vm0, %v1612_v1 }
 0x3e0   :  { %516 = vst [vmem:[#allocation10 + $0xc] sm:$0xf] %v514_v63  ;;  %1432 = vmatprep.subr.bf16.mxu1 %v1610_v0 }
 0x3e3   :  { %1434 = vmatpush3.bf16.msra.mxu1 %v1694_v7 }
 0x3e4   :  { %1435 = vmatprep.subr.bf16.mxu1 %v1610_v0 }
 0x3e7   :  { %1437 = vmatpush3.bf16.msra.mxu1 %v1698_v12 }
 0x3e8   :  { %1438 = vmatprep.subr.bf16.mxu1 %v1610_v0 }
 0x3eb   :  { %1440 = vmatpush3.bf16.msra.mxu1 %v1705_v16 }
 0x3ec   :  { %1441 = vmatprep.subr.bf16.mxu1 %v1610_v0 }
 0x3ef   :  { %1443 = vmatpush3.bf16.msra.mxu1 %v1711_v19 }
 0x3f0   :  { %1444 = vmatprep.subr.bf16.mxu1 %v1610_v0 }
 0x3f3   :  { %1446 = vmatpush3.bf16.msra.mxu1 %v1717_v22 }
 0x3f4   :  { %1447 = vmatprep.subr.bf16.mxu1 %v1610_v0 }
 0x3f7   :  { %1449 = vmatpush3.bf16.msra.mxu1 %v1723_v25 }
 0x3f8   :  { %1450 = vmatprep.subr.bf16.mxu1 %v1610_v0 }
 0x3fb   :  { %1452 = vmatpush3.bf16.msra.mxu1 %v1729_v28 }
 0x4b1   :  { %v585_v3 = vpop.f32.mrb[4].mxu1 }
 0x4b2   :  { %v589_v4 = vadd.f32 %v585_v3, %v172_v2  ;;  %v1179_v6 = vpop.f32.mrb[5].mxu1 }
 0x4b4   :  { %1501 = vtanh.f32 %v589_v4 }
 0x4be   :  { %v1502_v8 = vpop.eup %1501 }
 0x4bf   :  { %v591_v9 = vpack.c.bf16 %v1502_v8, %v1502_v8  ;;  %1213 = vmatmul.mubr.f32.vlgmr.msra.gmra.mrb[12].mxu0 %v1502_v8 }
 0x4c0   :  { %1455 = vmatpush3.bf16.msra.mxu0 %v1691_v5  ;;  %1282 = vmatprep.mubr.msk.f32.mxu0 %vm1611_vm0, %v1612_v1  ;;  %v175_v1 = vadd.f32 %v1770_v35, %v1797_v45 }
 0x4c1   :  { %593 = vst [vmem:[#allocation10 + $0x10] sm:$0xf] %v591_v9  ;;  %1456 = vmatprep.subr.bf16.mxu0 %v1610_v0 }
 0x4c4   :  { %1458 = vmatpush3.bf16.msra.mxu0 %v1694_v7 }
 0x4c5   :  { %1459 = vmatprep.subr.bf16.mxu0 %v1610_v0 }
 0x4c8   :  { %1461 = vmatpush3.bf16.msra.mxu0 %v1698_v12 }
 0x4c9   :  { %1462 = vmatprep.subr.bf16.mxu0 %v1610_v0 }
 0x4cc   :  { %1464 = vmatpush3.bf16.msra.mxu0 %v1705_v16 }
 0x4cd   :  { %1465 = vmatprep.subr.bf16.mxu0 %v1610_v0 }
 0x4d0   :  { %1467 = vmatpush3.bf16.msra.mxu0 %v1711_v19 }
 0x4d1   :  { %1468 = vmatprep.subr.bf16.mxu0 %v1610_v0 }
 0x4d4   :  { %1470 = vmatpush3.bf16.msra.mxu0 %v1717_v22 }
 0x4d5   :  { %1471 = vmatprep.subr.bf16.mxu0 %v1610_v0 }
 0x4d8   :  { %1473 = vmatpush3.bf16.msra.mxu0 %v1723_v25 }
 0x4d9   :  { %1474 = vmatprep.subr.bf16.mxu0 %v1610_v0 }
 0x4dc   :  { %1476 = vmatpush3.bf16.msra.mxu0 %v1729_v28 }
 0x592   :  { %v662_v5 = vpop.f32.mrb[12].mxu0 }
 0x593   :  { %v666_v7 = vadd.f32 %v662_v5, %v175_v1  ;;  %v1214_v10 = vpop.f32.mrb[13].mxu0 }
 0x595   :  { %1503 = vtanh.f32 %v666_v7 }
 0x59f   :  { %v1504_v11 = vpop.eup %1503 }
 0x5a0   :  { %v668_v12 = vpack.c.bf16 %v1504_v11, %v1504_v11  ;;  %1248 = vmatmul.mubr.f32.vlgmr.msra.gmra.mrb[6].mxu1 %v1504_v11 }
 0x5a2   :  { %670 = vst [vmem:[#allocation10 + $0x14] sm:$0xf] %v668_v12 }
 0x673   :  { %v739_v14 = vpop.f32.mrb[6].mxu1 }
 0x674   :  { %v743_v15 = vadd.f32 %v739_v14, %v180_v13  ;;  %v1249_v16 = vpop.f32.mrb[7].mxu1 }
 0x676   :  { %1505 = vtanh.f32 %v743_v15 }
 0x680   :  { %v1506_v0 = vpop.eup %1505 }
 0x681   :  { %v745_v17 = vpack.c.bf16 %v1506_v0, %v1506_v0  ;;  %1283 = vmatmul.mubr.f32.vlgmr.msra.gmra.mrb[14].mxu0 %v1506_v0 }
 0x683   :  { %747 = vst [vmem:[#allocation10 + $0x18] sm:$0xf] %v745_v17 }
 0x754   :  { %v816_v19 = vpop.f32.mrb[14].mxu0 }
 0x755   :  { %v820_v20 = vadd.f32 %v816_v19, %v183_v18  ;;  %v1284_v21 = vpop.f32.mrb[15].mxu0 }
 0x757   :  { %1507 = vtanh.f32 %v820_v20 }
 0x761   :  { %v1508_v22 = vpop.eup %1507 }
 0x762   :  { %v822_v23 = vpack.c.bf16 %v1508_v22, %v1508_v22 }
 0x764   :  { %824 = vst [vmem:[#allocation10 + $0x1c] sm:$0xf] %v822_v23 }
 0x765   :  { %1586 = shalt.err (!%p1583_p0)
}
 0x766   :  { %s1587_s8 = scalar_lea.hbm %s1900_s4, 512 }
 0x767   :  { %p1588_p1 = scmp.ne.s32.totalorder %s1900_s4, %s1587_s8  ;;  %p1591_p2 = scmp.lt.u32.totalorder %s1587_s8, %s1900_s4 }
 0x769   :  { %p1593_p3 = pnand %p1591_p2, %p1588_p1 }
 0x76b   :  { %1596 = shalt.err (!%p1593_p3)
}
 0x76c   :  { %837 = dma.vmem_to_hbm [thread:$0]  %s832_s30, 512, %s1900_s4, [#allocation6], %s1605_s27, %s1605_s27, %s1606_s28  }
 0x76d   :  { %1601 = dma.done.wait [#allocation6], 512  }
 0x76e   :  { %1602 = vsyncadd [#allocation6], 4294966784 }
 0x76f   :  { %841 = vsyncpa [#allocation5], 1 }
 0x770   :  { %842 = vsyncpa [#allocation8], 1 }
 0x771   :  { %843 = vsyncpa [#allocation6], 1 }

</bundles_post_ra>
